<compile_context>
chip_gen: v7x
topology: tpu7x:2x2x1
jax: 0.10.0
libtpu: 0.0.40
codegen_flags: <defaults>
</compile_context>

<pallas_src>
import functools

import jax
import jax.numpy as jnp
import numpy as np
from jax.experimental import pallas as pl
from jax.experimental.pallas import tpu as pltpu


def layernorm_kernel(x_ref, a_ref, b_ref, o_ref, *, eps, d_model):
    x = x_ref[...]                                           # (TM, D) f32
    mean = jnp.mean(x, axis=-1, keepdims=True)               # (TM, 1)
    centered = x - mean
    # torch.Tensor.std is the *unbiased* estimator: denominator (D - 1).
    var = jnp.sum(centered * centered, axis=-1, keepdims=True) / (d_model - 1)
    std = jnp.sqrt(var)
    o_ref[...] = a_ref[...] * centered / (std + eps) + b_ref[...]


def layer_norm(x2d, a_2, b_2, *, eps=1e-6):
    """PyTorch-semantics LayerNorm over the last dim of a (rows, d_model) array."""
    rows, d = x2d.shape
    a_2 = a_2.reshape(1, d).astype(jnp.float32)
    b_2 = b_2.reshape(1, d).astype(jnp.float32)
    x2d = x2d.astype(jnp.float32)

    # Row tile: multiple of 8 (f32 sublane), capped so the tile trivially fits VMEM.
    tile_rows = min(512, pl.cdiv(rows, 8) * 8)
    padded_rows = pl.cdiv(rows, tile_rows) * tile_rows
    if padded_rows != rows:
        x2d = jnp.pad(x2d, ((0, padded_rows - rows), (0, 0)))
    grid = (padded_rows // tile_rows,)

    kernel = functools.partial(layernorm_kernel, eps=float(eps), d_model=d)

    flops = 8 * padded_rows * d                      # sub, mul, sums, scale, bias
    bytes_accessed = (2 * padded_rows * d + 2 * d) * 4

    out = pl.pallas_call(
        kernel,
        out_shape=jax.ShapeDtypeStruct((padded_rows, d), jnp.float32),
        grid_spec=pltpu.PrefetchScalarGridSpec(
            num_scalar_prefetch=0,
            grid=grid,
            in_specs=[
                pl.BlockSpec((tile_rows, d), lambda i: (i, 0)),   # x tile (pipelined)
                pl.BlockSpec((1, d), lambda i: (0, 0)),           # gain: VMEM-resident
                pl.BlockSpec((1, d), lambda i: (0, 0)),           # bias: VMEM-resident
            ],
            out_specs=pl.BlockSpec((tile_rows, d), lambda i: (i, 0)),
        ),
        compiler_params=pltpu.CompilerParams(
            dimension_semantics=("parallel",)),
        cost_estimate=pl.CostEstimate(
            flops=flops, transcendentals=0, bytes_accessed=bytes_accessed),
    )(x2d, a_2, b_2)

    return out[:rows]


def transformer_stack(x, mask, params, *, eps=1e-6):
    """TransformerStack.forward: apply n_blocks layers, then the final LayerNorm.

    x: (B, S, D) float32, mask: attention mask passed through to the layers.
    """
    del mask  # Only consumed by the (unspecified) per-layer module; see TODO.
    # TODO(synk): the TransformerBlock `layer` module is not defined in the spec
    # (only the stack skeleton + LayerNorm are given), so each of the n_blocks
    # layer applications is a pass-through here instead of a faked block.
    for _ in range(params["n_blocks"]):
        x = x  # placeholder for `x = layer(x, mask)`

    b, s, d = x.shape
    y = layer_norm(x.reshape(b * s, d), params["a_2"], params["b_2"], eps=eps)
    return y.reshape(b, s, d)


def transformer_stack_reference(x, mask, params, *, eps=1e-6):
    """Pure-JAX reference mirroring the PyTorch module (layers are pass-through)."""
    del mask
    for _ in range(params["n_blocks"]):
        x = x
    mean = jnp.mean(x, axis=-1, keepdims=True)
    std = jnp.std(x, axis=-1, keepdims=True, ddof=1)   # unbiased, like torch .std()
    return params["a_2"] * (x - mean) / (std + eps) + params["b_2"]


if __name__ == "__main__":
    batch, seq, d_model = 2, 8, 128     # lane-dense d_model (multiple of 128)
    n_blocks = 2
    eps = 1e-6

    key = jax.random.PRNGKey(0)
    kx, ka, kb = jax.random.split(key, 3)

    x = jax.random.normal(kx, (batch, seq, d_model), dtype=jnp.float32)
    mask = jnp.ones((batch, seq, seq), dtype=jnp.float32)

    # LayerNorm params (module init is ones/zeros; random values used here so the
    # gain/bias broadcast paths are actually exercised by the correctness check).
    params = {
        "n_blocks": n_blocks,
        "a_2": 1.0 + 0.1 * jax.random.normal(ka, (d_model,), dtype=jnp.float32),
        "b_2": 0.1 * jax.random.normal(kb, (d_model,), dtype=jnp.float32),
    }

    y = transformer_stack(x, mask, params, eps=eps)
    jax.block_until_ready(y)

    y_ref = transformer_stack_reference(x, mask, params, eps=eps)
    np.testing.assert_allclose(np.asarray(y), np.asarray(y_ref),
                               rtol=1e-5, atol=1e-5)
    print("KERNEL_OK")
</pallas_src>

<mosaic_0001>
module attributes {stable_mosaic.version = 11 : i64} {
  func.func @layernorm_kernel(%arg0: i32, %arg1: memref<16x128xf32, #tpu.memory_space<vmem>>, %arg2: memref<1x128xf32, #tpu.memory_space<vmem>>, %arg3: memref<1x128xf32, #tpu.memory_space<vmem>>, %arg4: memref<16x128xf32, #tpu.memory_space<vmem>>) attributes {dimension_semantics = [#tpu.dimension_semantics<parallel>], iteration_bounds = array<i64: 1>, scalar_prefetch = 0 : i64, scratch_operands = 0 : i64, tpu.core_type = #tpu.core_type<tc>, window_params = [{transform_indices = @transform_0, window_bounds = array<i64: 16, 128>}, {pipeline_mode = #tpu.pipeline_mode<synchronous>, transform_indices = @transform_1, window_bounds = array<i64: 1, 128>}, {pipeline_mode = #tpu.pipeline_mode<synchronous>, transform_indices = @transform_2, window_bounds = array<i64: 1, 128>}, {transform_indices = @transform_3, window_bounds = array<i64: 16, 128>}]} {
    %c0 = arith.constant 0 : index
    %c0_0 = arith.constant 0 : index
    %0 = vector.load %arg1[%c0, %c0_0] : memref<16x128xf32, #tpu.memory_space<vmem>>, vector<16x128xf32>
    %cst = arith.constant dense<0.000000e+00> : vector<16xf32>
    %1 = vector.multi_reduction <add>, %0, %cst [1] : vector<16x128xf32> to vector<16xf32>
    %2 = vector.shape_cast %1 : vector<16xf32> to vector<16x1xf32>
    %cst_1 = arith.constant 1.280000e+02 : f32
    %3 = vector.broadcast %cst_1 : f32 to vector<16x1xf32>
    %4 = arith.divf %2, %3 : vector<16x1xf32>
    %5 = vector.broadcast %4 : vector<16x1xf32> to vector<16x128xf32>
    %6 = arith.subf %0, %5 : vector<16x128xf32>
    %7 = arith.mulf %6, %6 : vector<16x128xf32>
    %cst_2 = arith.constant dense<0.000000e+00> : vector<16xf32>
    %8 = vector.multi_reduction <add>, %7, %cst_2 [1] : vector<16x128xf32> to vector<16xf32>
    %9 = vector.shape_cast %8 : vector<16xf32> to vector<16x1xf32>
    %cst_3 = arith.constant 1.270000e+02 : f32
    %10 = vector.broadcast %cst_3 : f32 to vector<16x1xf32>
    %11 = arith.divf %9, %10 : vector<16x1xf32>
    %12 = math.sqrt %11 : vector<16x1xf32>
    %c0_4 = arith.constant 0 : index
    %c0_5 = arith.constant 0 : index
    %13 = vector.load %arg2[%c0_4, %c0_5] : memref<1x128xf32, #tpu.memory_space<vmem>>, vector<1x128xf32>
    %14 = vector.broadcast %13 : vector<1x128xf32> to vector<16x128xf32>
    %15 = arith.mulf %14, %6 : vector<16x128xf32>
    %cst_6 = arith.constant 9.99999997E-7 : f32
    %16 = vector.broadcast %cst_6 : f32 to vector<16x1xf32>
    %17 = arith.addf %12, %16 : vector<16x1xf32>
    %18 = vector.broadcast %17 : vector<16x1xf32> to vector<16x128xf32>
    %19 = arith.divf %15, %18 : vector<16x128xf32>
    %c0_7 = arith.constant 0 : index
    %c0_8 = arith.constant 0 : index
    %20 = vector.load %arg3[%c0_7, %c0_8] : memref<1x128xf32, #tpu.memory_space<vmem>>, vector<1x128xf32>
    %21 = vector.broadcast %20 : vector<1x128xf32> to vector<16x128xf32>
    %22 = arith.addf %19, %21 : vector<16x128xf32>
    %c0_9 = arith.constant 0 : index
    %c0_10 = arith.constant 0 : index
    %23 = vector.load %arg4[%c0_9, %c0_10] : memref<16x128xf32, #tpu.memory_space<vmem>>, vector<16x128xf32>
    tpu.vector_store %arg4[%c0_9, %c0_10], %22 {strides = array<i32>} : memref<16x128xf32, #tpu.memory_space<vmem>>, vector<16x128xf32>,
    return
  }
  func.func @transform_0(%arg0: i32) -> (i32, i32) {
    %c0_i32 = arith.constant 0 : i32
    %c0_i32_0 = arith.constant 0 : i32
    return %arg0, %c0_i32 : i32, i32
  }
  func.func @transform_1(%arg0: i32) -> (i32, i32) {
    %c0_i32 = arith.constant 0 : i32
    %c0_i32_0 = arith.constant 0 : i32
    %c0_i32_1 = arith.constant 0 : i32
    return %c0_i32, %c0_i32_0 : i32, i32
  }
  func.func @transform_2(%arg0: i32) -> (i32, i32) {
    %c0_i32 = arith.constant 0 : i32
    %c0_i32_0 = arith.constant 0 : i32
    %c0_i32_1 = arith.constant 0 : i32
    return %c0_i32, %c0_i32_0 : i32, i32
  }
  func.func @transform_3(%arg0: i32) -> (i32, i32) {
    %c0_i32 = arith.constant 0 : i32
    %c0_i32_0 = arith.constant 0 : i32
    return %arg0, %c0_i32 : i32, i32
  }
}

</mosaic_0001>

<bundles_post_ra>
// kernel: tpu_custom_call.1
= control target key start
LH: loop header
LB: loop body
LE: loop exit
PB: predicated region body
PF: predicated region fallthrough
CT: control target
= control target key end

     0   :  { %8 = vsyncpa [#allocation3], 0  ;;  %s228_s0 = inlined_call_operand.hbm [shape: f32[16,128], index: 0, kind: input, shape index: {}]   ;;  %s229_s1 = inlined_call_operand.vmem [shape: f32[1,128], index: 1, kind: input, shape index: {}]   ;;  %s230_s2 = inlined_call_operand.vmem [shape: f32[1,128], index: 2, kind: input, shape index: {}]   ;;  %s231_s3 = inlined_call_operand.hbm [shape: f32[16,128], index: 3, kind: output, shape index: {}]  }
   0x1   :  { %9 = vsyncpa [#allocation4], 0  ;;  %s168_s12 = smov [#allocation2]   ;;  %s120_s16 = scalar_lea.hbm %s228_s0, 256 }
   0x2   :  { %s15_s13 = sshll.u32 %s168_s12, 4  ;;  %p121_p0 = scmp.ne.s32.totalorder %s228_s0, %s120_s16  ;;  %s16_s13 = int_to_ptr.vmem [resolvable:$true] %s15_s13 }
   0x3   :  { %p124_p1 = scmp.lt.u32.totalorder %s120_s16, %s228_s0 }
   0x5   :  { %p126_p2 = pnand %p124_p1, %p121_p0 }
   0x7   :  { %129 = shalt.err (!%p126_p2)
}
   0x8   :  { %s130_s21 = scalar_lea.vmem %s16_s13, 256  ;;  %p135_p4 = scmp.lt.s32.totalorder %s16_s13, %s16_s13 }
   0x9   :  { %p131_p3 = scmp.ne.s32.totalorder %s16_s13, %s130_s21  ;;  %p136_p5 = scmp.lt.s32.totalorder %s130_s21, %s130_s21 }
   0xb   :  { %p137_p6 = por %p136_p5, %p135_p4 }
   0xd   :  { %p138_p7 = pnand %p137_p6, %p131_p3 }
   0xf   :  { %141 = shalt.err (!%p138_p7)
}
  0x10   :  { %s169_s22 = smov 128   ;;  %s170_s23 = smov 8  }
  0x11   :  { %21 = dma.hbm_to_vmem [thread:$0]  %s228_s0, 256, %s16_s13, [#allocation3], %s169_s22, %s169_s22, %s170_s23  }
  0x12   :  { %164 = dma.done.wait [#allocation3], 256  }
  0x13   :  { %165 = vsyncadd [#allocation3], 4294967040  ;;  %v29_v0 = vld [vmem:[#allocation2] sm:$0xff]  ;;  %v30_v1 = vld [vmem:[#allocation2 + $0x8] sm:$0xff]  ;;  %s171_s29 = smov [#allocation5]  }
  0x14   :  { %31 = vadd.xlane.f32.xlu0 %v29_v0  ;;  %v106_v26 = vld [vmem:[%s229_s1] ss:$0 sm:$0xff]  ;;  %s94_s30 = sshll.u32 %s171_s29, 4  ;;  %s95_s30 = int_to_ptr.vmem [resolvable:$true] %s94_s30 }
  0x15   :  { %v107_v29 = vld [vmem:[%s230_s2] ss:$0 sm:$0xff]  ;;  %s142_s4 = scalar_lea.vmem %s95_s30, 256  ;;  %p147_p9 = scmp.lt.s32.totalorder %s95_s30, %s95_s30 }
  0x16   :  { %p143_p8 = scmp.ne.s32.totalorder %s95_s30, %s142_s4  ;;  %p148_p10 = scmp.lt.s32.totalorder %s142_s4, %s142_s4 }
  0x18   :  { %33 = vadd.xlane.f32.xlu0 %v30_v1  ;;  %p149_p11 = por %p148_p10, %p147_p9 }
  0x1a   :  { %p150_p12 = pnand %p149_p11, %p143_p8 }
  0xa1   :  { %v32_v2 = vpop.xlane.xlu0 %31 }
  0xa2   :  { %v36_v3 = vmul.f32 0.0078125, %v32_v2 }
  0xa4   :  { %v38_v4 = vsub.f32 %v29_v0, %v36_v3 }
  0xa5   :  { %v34_v5 = vpop.xlane.xlu0 %33 }
  0xa6   :  { %v37_v6 = vmul.f32 0.0078125, %v34_v5  ;;  %v40_v7 = vmul.f32 %v38_v4, %v38_v4  ;;  %v70_v27 = vmul.f32 %v106_v26, %v38_v4 }
  0xa8   :  { %v39_v8 = vsub.f32 %v30_v1, %v37_v6  ;;  %42 = vadd.xlane.f32.xlu1 %v40_v7 }
  0xaa   :  { %v41_v9 = vmul.f32 %v39_v8, %v39_v8  ;;  %v71_v31 = vmul.f32 %v106_v26, %v39_v8 }
  0xac   :  { %44 = vadd.xlane.f32.xlu1 %v41_v9 }
 0x135   :  { %v43_v10 = vpop.xlane.xlu1 %42 }
 0x136   :  { %v47_v11 = vmul.f32 0.007874016, %v43_v10 }
 0x138   :  { %112 = vrsqrt.f32 %v47_v11  ;;  %vm51_vm0 = vcmp.eq.f32.partialorder %v47_v11, inf  ;;  %v54_v16 = vand.u32 2147483648, %v47_v11  ;;  %vm53_vm1 = vcmp.eq.f32.partialorder %v47_v11, 0.0 }
 0x139   :  { %v45_v12 = vpop.xlane.xlu1 %44 }
 0x13a   :  { %v48_v13 = vmul.f32 0.007874016, %v45_v12 }
 0x13c   :  { %114 = vrsqrt.f32 %v48_v13  ;;  %vm58_vm2 = vcmp.eq.f32.partialorder %v48_v13, inf  ;;  %v61_v22 = vand.u32 2147483648, %v48_v13  ;;  %vm60_vm3 = vcmp.eq.f32.partialorder %v48_v13, 0.0 }
 0x142   :  { %v113_v14 = vpop.eup %112 }
 0x143   :  { %v50_v15 = vmul.f32 %v113_v14, %v47_v11 }
 0x145   :  { %v52_v17 = vsel %vm51_vm0, %v47_v11, %v50_v15 }
 0x146   :  { %v115_v18 = vpop.eup %114  ;;  %v55_v19 = vsel %vm53_vm1, %v54_v16, %v52_v17 }
 0x147   :  { %v57_v20 = vmul.f32 %v115_v18, %v48_v13  ;;  %v72_v21 = vadd.f32 1e-06, %v55_v19 }
 0x149   :  { %v59_v23 = vsel %vm58_vm2, %v48_v13, %v57_v20  ;;  %116 = vrcp.f32 %v72_v21 }
 0x14a   :  { %v62_v24 = vsel %vm60_vm3, %v61_v22, %v59_v23 }
 0x14b   :  { %v73_v25 = vadd.f32 1e-06, %v62_v24 }
 0x14d   :  { %118 = vrcp.f32 %v73_v25 }
 0x153   :  { %v117_v28 = vpop.eup %116 }
 0x154   :  { %v75_v30 = vmul.f32 %v117_v28, %v70_v27 }
 0x156   :  { %v85_v32 = vadd.f32 %v107_v29, %v75_v30 }
 0x157   :  { %v119_v33 = vpop.eup %118 }
 0x158   :  { %v77_v34 = vmul.f32 %v119_v33, %v71_v31  ;;  %87 = vst [vmem:[#allocation5] sm:$0xff] %v85_v32 }
 0x15a   :  { %v86_v35 = vadd.f32 %v107_v29, %v77_v34 }
 0x15c   :  { %88 = vst [vmem:[#allocation5 + $0x8] sm:$0xff] %v86_v35 }
 0x15d   :  { %153 = shalt.err (!%p150_p12)
}
 0x15e   :  { %s154_s5 = scalar_lea.hbm %s231_s3, 256 }
 0x15f   :  { %p155_p13 = scmp.ne.s32.totalorder %s231_s3, %s154_s5  ;;  %p158_p0 = scmp.lt.u32.totalorder %s154_s5, %s231_s3 }
 0x161   :  { %p160_p1 = pnand %p158_p0, %p155_p13 }
 0x163   :  { %163 = shalt.err (!%p160_p1)
}
 0x164   :  { %100 = dma.vmem_to_hbm [thread:$0]  %s95_s30, 256, %s231_s3, [#allocation4], %s169_s22, %s169_s22, %s170_s23  }
 0x165   :  { %166 = dma.done.wait [#allocation4], 256  }
 0x166   :  { %167 = vsyncadd [#allocation4], 4294967040 }
 0x167   :  { %104 = vsyncpa [#allocation3], 1 }
 0x168   :  { %105 = vsyncpa [#allocation4], 1 }

</bundles_post_ra>
